<compile_context>
chip_gen: v6e
topology: v6e:2x2x1
jax: 0.10.0
libtpu: 0.0.40
codegen_flags: <defaults>
</compile_context>

<pallas_src>
import functools
import math

import jax
import jax.numpy as jnp
from jax.experimental import pallas as pl
from jax.experimental.pallas import tpu as pltpu


# Sublane alignment that is tile-clean for both f32 (8) and bf16 (16) blocks.
_SUBLANE_ALIGN = 16
_LANE_ALIGN = 128


def _round_up(x: int, m: int) -> int:
    return ((x + m - 1) // m) * m


def _lif_layer_kernel(spikes_ref, w_ref, *out_refs,
                      alpha, beta, dt, v_th, emit_traces):
    """One batch tile.

    spikes_ref: (T, B_TILE, P_pad)  previous-layer spike trains (time-major)
    w_ref:      (P_pad, N_pad)      synaptic weights
    out_refs:   emit_traces -> (v_ref, i_ref, s_ref), each (T, B_TILE, N_pad)
                else        -> (s_ref,)
    """
    if emit_traces:
        v_ref, i_ref, s_ref = out_refs
    else:
        (s_ref,) = out_refs

    T, Bt, P = spikes_ref.shape
    N = w_ref.shape[1]

    # Synaptic drive for every (time, batch) row of the tile in ONE MXU matmul;
    # bf16 inputs, f32 accumulate. Result stays in vregs (no scratch round trip
    # for these tile sizes).
    drive = jnp.dot(spikes_ref[...].reshape(T * Bt, P), w_ref[...],
                    preferred_element_type=jnp.float32).reshape(T, Bt, N)

    v_prev = jnp.zeros((Bt, N), jnp.float32)
    i_prev = jnp.zeros((Bt, N), jnp.float32)
    s_prev = jnp.zeros((Bt, N), jnp.float32)

    # Statically unrolled temporal recurrence; each step is a full
    # (B_TILE, N_pad) sublane x lane dense slab (full-width VPU ops / stores).
    for t in range(T):
        i_t = alpha * i_prev + drive[t]                  # synaptic current filter
        v_t = beta * v_prev * (1.0 - s_prev) + dt * i_t  # leaky membrane, reset-to-zero
        s_t = (v_t >= v_th).astype(jnp.float32)          # Heaviside spike
        if emit_traces:
            v_ref[t] = v_t
            i_ref[t] = i_t
        s_ref[t] = s_t.astype(s_ref.dtype)
        v_prev, i_prev, s_prev = v_t, i_t, s_t


def lif_layer_forward(prv_spikes, weights, *, step_size, tau_m, tau_s, v_th,
                      emit_traces, spike_dtype, b_tile):
    """Pallas equivalent of LIF_Layer.forward on padded, time-major tensors.

    prv_spikes: (T, B_pad, P_pad)  (lane-padded, batch padded to b_tile)
    weights:    (P_pad, N_pad)
    Returns [voltage, current, spikes] if emit_traces else [spikes],
    all shaped (T, B_pad, N_pad).
    """
    T, B_pad, P_pad = prv_spikes.shape
    P_w, N_pad = weights.shape
    assert P_w == P_pad
    assert B_pad % b_tile == 0

    alpha = 1.0 - step_size / tau_s
    beta = 1.0 - step_size / tau_m

    kernel = functools.partial(_lif_layer_kernel, alpha=alpha, beta=beta,
                               dt=step_size, v_th=v_th,
                               emit_traces=emit_traces)

    if emit_traces:
        out_shape = [jax.ShapeDtypeStruct((T, B_pad, N_pad), jnp.float32),
                     jax.ShapeDtypeStruct((T, B_pad, N_pad), jnp.float32),
                     jax.ShapeDtypeStruct((T, B_pad, N_pad), spike_dtype)]
    else:
        out_shape = [jax.ShapeDtypeStruct((T, B_pad, N_pad), spike_dtype)]

    def act_spec(last_dim):
        return pl.BlockSpec((T, b_tile, last_dim), lambda b: (0, b, 0))

    out_specs = [act_spec(N_pad) for _ in out_shape]

    return pl.pallas_call(
        kernel,
        out_shape=out_shape,
        grid_spec=pltpu.PrefetchScalarGridSpec(
            num_scalar_prefetch=0,
            grid=(B_pad // b_tile,),
            in_specs=[
                act_spec(P_pad),                                   # spike tile
                pl.BlockSpec((P_pad, N_pad), lambda b: (0, 0)),    # full weights
            ],
            out_specs=out_specs,
        ),
        compiler_params=pltpu.CompilerParams(
            dimension_semantics=("parallel",),
            vmem_limit_bytes=48 * 1024 * 1024),
    )(prv_spikes, weights)


class MNISTNetworkPallas:
    """JAX/Pallas port of MNIST_Network.forward (forward pass only)."""

    def __init__(self, num_step, step_size, layer_neurons, layer_hparams, key,
                 mxu_dtype=jnp.bfloat16):
        assert len(layer_neurons) == len(layer_hparams)
        self.num_step = num_step
        self.step_size = step_size
        self.hparams = list(layer_hparams)
        self.layer_neurons = list(layer_neurons)
        self.mxu_dtype = mxu_dtype

        self.weights = []          # unpadded f32 (reference copies)
        self.weights_padded = []   # (P_pad, N_pad) in mxu_dtype for the kernel
        prv = None
        for n in layer_neurons:
            if prv is None:
                prv = n
            key, sub = jax.random.split(key)
            # kaiming_normal_ on a (prv, n) tensor: fan_in = size(1) = n, gain = sqrt(2)
            std = math.sqrt(2.0 / n)
            w = std * jax.random.normal(sub, (prv, n), jnp.float32)
            self.weights.append(w)
            prv_pad = _round_up(prv, _LANE_ALIGN)
            n_pad = _round_up(n, _LANE_ALIGN)
            wp = jnp.zeros((prv_pad, n_pad), jnp.float32).at[:prv, :n].set(w)
            self.weights_padded.append(wp.astype(mxu_dtype))
            prv = n

    def get_weights(self, idx):
        return self.weights[idx]

    def _pick_b_tile(self, B):
        """Largest batch tile (multiple of 16) whose double-buffered working set
        fits a conservative VMEM budget; >=2 grid steps when batch allows it."""
        T = self.num_step
        in_bytes = jnp.dtype(self.mxu_dtype).itemsize
        budget = 16 * 1024 * 1024          # per-grid-step target (x2 for dbl buffer)
        worst = 1
        prv_pad = _round_up(self.layer_neurons[0], _LANE_ALIGN)
        for idx, n in enumerate(self.layer_neurons):
            n_pad = _round_up(n, _LANE_ALIGN)
            traces = idx == len(self.layer_neurons) - 1
            out_b = T * n_pad * (3 * 4 if traces else in_bytes)
            worst = max(worst, T * prv_pad * in_bytes + out_b)
            prv_pad = n_pad
        bt = budget // (2 * worst)
        bt = max(_SUBLANE_ALIGN, (bt // _SUBLANE_ALIGN) * _SUBLANE_ALIGN)
        b_min = _round_up(B, _SUBLANE_ALIGN)
        bt = min(bt, b_min)
        # v7x has 2 TensorCores: prefer at least 2 grid steps when possible.
        if bt == b_min and bt % (2 * _SUBLANE_ALIGN) == 0:
            bt //= 2
        return int(bt)

    def __call__(self, input_spikes):
        B, T, N0 = input_spikes.shape
        assert T == self.num_step
        assert N0 == self.layer_neurons[0]

        b_tile = self._pick_b_tile(B)
        B_pad = _round_up(max(B, b_tile), b_tile)
        n0_pad = _round_up(N0, _LANE_ALIGN)

        # Time-major, lane/sublane padded spike stream. Spikes are 0/1 so the
        # bf16 cast is lossless. (The reference's p_voltage = ones_like(...) is
        # dropped: the forward dynamics never read prv_voltage.)
        x = jnp.transpose(input_spikes.astype(self.mxu_dtype), (1, 0, 2))
        x = jnp.pad(x, ((0, 0), (0, B_pad - B), (0, n0_pad - N0)))

        p_spikes = x
        v = i = s = None
        last = len(self.weights_padded) - 1
        for idx, (wp, hp) in enumerate(zip(self.weights_padded, self.hparams)):
            emit_traces = (idx == last)
            outs = lif_layer_forward(
                p_spikes, wp,
                step_size=self.step_size,
                tau_m=hp["tau_m"], tau_s=hp["tau_s"], v_th=hp["v_th"],
                emit_traces=emit_traces,
                spike_dtype=jnp.float32 if emit_traces else self.mxu_dtype,
                b_tile=b_tile)
            if emit_traces:
                v, i, s = outs
            else:
                s = outs[0]
            p_spikes = s

        n_last = self.layer_neurons[-1]

        def unpack(a):
            # (T, B_pad, N_pad) -> (B, T, n_last), drop padding, back to batch-major.
            return jnp.transpose(a[:, :B, :n_last], (1, 0, 2)).astype(jnp.float32)

        return unpack(v), unpack(i), unpack(s)


if __name__ == "__main__":
    batch = 2
    num_step = 8
    layer_neurons = [32, 16]                 # hyper_params['num_neuron'] per layer
    step_size = 0.05
    layer_hparams = [
        {"tau_m": 0.2, "tau_s": 0.1, "v_th": 0.2},
        {"tau_m": 0.2, "tau_s": 0.1, "v_th": 0.2},
    ]

    key = jax.random.PRNGKey(0)
    key, k_in, k_w = jax.random.split(key, 3)

    # input_spikes_: (batch, num_step, num_neuron) binary spike trains
    x = jax.random.bernoulli(k_in, p=0.3,
                             shape=(batch, num_step, layer_neurons[0])
                             ).astype(jnp.float32)

    net = MNISTNetworkPallas(num_step, step_size, layer_neurons,
                             layer_hparams, k_w)
    v, i, s = net(x)
    jax.block_until_ready((v, i, s))

    assert v.shape == (batch, num_step, layer_neurons[-1])
    assert i.shape == (batch, num_step, layer_neurons[-1])
    assert s.shape == (batch, num_step, layer_neurons[-1])
    assert bool(jnp.all(jnp.isfinite(v)))
    assert bool(jnp.all((s == 0.0) | (s == 1.0)))
    print("KERNEL_OK")
</pallas_src>

<mosaic_0001>
module attributes {stable_mosaic.version = 11 : i64} {
  func.func @_lif_layer_kernel(%arg0: i32, %arg1: memref<8x16x128xbf16, #tpu.memory_space<vmem>>, %arg2: memref<128x128xbf16, #tpu.memory_space<vmem>>, %arg3: memref<8x16x128xbf16, #tpu.memory_space<vmem>>) attributes {dimension_semantics = [#tpu.dimension_semantics<parallel>], iteration_bounds = array<i64: 1>, scalar_prefetch = 0 : i64, scratch_operands = 0 : i64, tpu.core_type = #tpu.core_type<tc>, window_params = [{transform_indices = @transform_0, window_bounds = array<i64: 8, 16, 128>}, {pipeline_mode = #tpu.pipeline_mode<synchronous>, transform_indices = @transform_1, window_bounds = array<i64: 128, 128>}, {transform_indices = @transform_2, window_bounds = array<i64: 8, 16, 128>}]} {
    %c0 = arith.constant 0 : index
    %c0_0 = arith.constant 0 : index
    %c0_1 = arith.constant 0 : index
    %0 = vector.load %arg1[%c0, %c0_0, %c0_1] : memref<8x16x128xbf16, #tpu.memory_space<vmem>>, vector<8x16x128xbf16>
    %1 = vector.shape_cast %0 : vector<8x16x128xbf16> to vector<128x128xbf16>
    %c0_2 = arith.constant 0 : index
    %c0_3 = arith.constant 0 : index
    %2 = vector.load %arg2[%c0_2, %c0_3] : memref<128x128xbf16, #tpu.memory_space<vmem>>, vector<128x128xbf16>
    %cst = arith.constant dense<0.000000e+00> : vector<128x128xf32>
    %3 = tpu.matmul %1, %2, %cst {dimension_numbers = #tpu.dot_dimension_numbers<[1], [0], [0], [1], [0, 0, 1, 1], [], []>} : vector<128x128xbf16>, vector<128x128xbf16>, vector<128x128xf32> -> vector<128x128xf32>
    %4 = vector.shape_cast %3 : vector<128x128xf32> to vector<8x16x128xf32>
    %cst_4 = arith.constant 0.000000e+00 : f32
    %5 = vector.broadcast %cst_4 : f32 to vector<16x128xf32>
    %cst_5 = arith.constant 0.000000e+00 : f32
    %6 = vector.broadcast %cst_5 : f32 to vector<16x128xf32>
    %cst_6 = arith.constant 0.000000e+00 : f32
    %7 = vector.broadcast %cst_6 : f32 to vector<16x128xf32>
    %cst_7 = arith.constant 5.000000e-01 : f32
    %8 = vector.broadcast %cst_7 : f32 to vector<16x128xf32>
    %9 = arith.mulf %8, %6 : vector<16x128xf32>
    %10 = vector.extract_strided_slice %4 {offsets = [0, 0, 0], sizes = [1, 16, 128], strides = [1, 1, 1]} : vector<8x16x128xf32> to vector<1x16x128xf32>
    %11 = vector.shape_cast %10 : vector<1x16x128xf32> to vector<16x128xf32>
    %12 = arith.addf %9, %11 : vector<16x128xf32>
    %cst_8 = arith.constant 7.500000e-01 : f32
    %13 = vector.broadcast %cst_8 : f32 to vector<16x128xf32>
    %14 = arith.mulf %13, %5 : vector<16x128xf32>
    %cst_9 = arith.constant 1.000000e+00 : f32
    %15 = vector.broadcast %cst_9 : f32 to vector<16x128xf32>
    %16 = arith.subf %15, %7 : vector<16x128xf32>
    %17 = arith.mulf %14, %16 : vector<16x128xf32>
    %cst_10 = arith.constant 5.000000e-02 : f32
    %18 = vector.broadcast %cst_10 : f32 to vector<16x128xf32>
    %19 = arith.mulf %18, %12 : vector<16x128xf32>
    %20 = arith.addf %17, %19 : vector<16x128xf32>
    %cst_11 = arith.constant 2.000000e-01 : f32
    %21 = vector.broadcast %cst_11 : f32 to vector<16x128xf32>
    %22 = arith.cmpf oge, %20, %21 : vector<16x128xf32>
    %23 = arith.extui %22 : vector<16x128xi1> to vector<16x128xi32>
    %24 = arith.sitofp %23 : vector<16x128xi32> to vector<16x128xf32>
    %25 = arith.truncf %24 : vector<16x128xf32> to vector<16x128xbf16>
    %c0_12 = arith.constant 0 : index
    %c0_13 = arith.constant 0 : index
    %c0_14 = arith.constant 0 : index
    %26 = vector.load %arg3[%c0_12, %c0_13, %c0_14] : memref<8x16x128xbf16, #tpu.memory_space<vmem>>, vector<1x16x128xbf16>
    %27 = vector.shape_cast %26 : vector<1x16x128xbf16> to vector<16x128xbf16>
    %28 = vector.shape_cast %25 : vector<16x128xbf16> to vector<1x16x128xbf16>
    tpu.vector_store %arg3[%c0_12, %c0_13, %c0_14], %28 {strides = array<i32>} : memref<8x16x128xbf16, #tpu.memory_space<vmem>>, vector<1x16x128xbf16>,
    %cst_15 = arith.constant 5.000000e-01 : f32
    %29 = vector.broadcast %cst_15 : f32 to vector<16x128xf32>
    %30 = arith.mulf %29, %12 : vector<16x128xf32>
    %31 = vector.extract_strided_slice %4 {offsets = [1, 0, 0], sizes = [1, 16, 128], strides = [1, 1, 1]} : vector<8x16x128xf32> to vector<1x16x128xf32>
    %32 = vector.shape_cast %31 : vector<1x16x128xf32> to vector<16x128xf32>
    %33 = arith.addf %30, %32 : vector<16x128xf32>
    %cst_16 = arith.constant 7.500000e-01 : f32
    %34 = vector.broadcast %cst_16 : f32 to vector<16x128xf32>
    %35 = arith.mulf %34, %20 : vector<16x128xf32>
    %cst_17 = arith.constant 1.000000e+00 : f32
    %36 = vector.broadcast %cst_17 : f32 to vector<16x128xf32>
    %37 = arith.subf %36, %24 : vector<16x128xf32>
    %38 = arith.mulf %35, %37 : vector<16x128xf32>
    %cst_18 = arith.constant 5.000000e-02 : f32
    %39 = vector.broadcast %cst_18 : f32 to vector<16x128xf32>
    %40 = arith.mulf %39, %33 : vector<16x128xf32>
    %41 = arith.addf %38, %40 : vector<16x128xf32>
    %cst_19 = arith.constant 2.000000e-01 : f32
    %42 = vector.broadcast %cst_19 : f32 to vector<16x128xf32>
    %43 = arith.cmpf oge, %41, %42 : vector<16x128xf32>
    %44 = arith.extui %43 : vector<16x128xi1> to vector<16x128xi32>
    %45 = arith.sitofp %44 : vector<16x128xi32> to vector<16x128xf32>
    %46 = arith.truncf %45 : vector<16x128xf32> to vector<16x128xbf16>
    %c1 = arith.constant 1 : index
    %c0_20 = arith.constant 0 : index
    %c0_21 = arith.constant 0 : index
    %47 = vector.load %arg3[%c1, %c0_20, %c0_21] : memref<8x16x128xbf16, #tpu.memory_space<vmem>>, vector<1x16x128xbf16>
    %48 = vector.shape_cast %47 : vector<1x16x128xbf16> to vector<16x128xbf16>
    %49 = vector.shape_cast %46 : vector<16x128xbf16> to vector<1x16x128xbf16>
    tpu.vector_store %arg3[%c1, %c0_20, %c0_21], %49 {strides = array<i32>} : memref<8x16x128xbf16, #tpu.memory_space<vmem>>, vector<1x16x128xbf16>,
    %cst_22 = arith.constant 5.000000e-01 : f32
    %50 = vector.broadcast %cst_22 : f32 to vector<16x128xf32>
    %51 = arith.mulf %50, %33 : vector<16x128xf32>
    %52 = vector.extract_strided_slice %4 {offsets = [2, 0, 0], sizes = [1, 16, 128], strides = [1, 1, 1]} : vector<8x16x128xf32> to vector<1x16x128xf32>
    %53 = vector.shape_cast %52 : vector<1x16x128xf32> to vector<16x128xf32>
    %54 = arith.addf %51, %53 : vector<16x128xf32>
    %cst_23 = arith.constant 7.500000e-01 : f32
    %55 = vector.broadcast %cst_23 : f32 to vector<16x128xf32>
    %56 = arith.mulf %55, %41 : vector<16x128xf32>
    %cst_24 = arith.constant 1.000000e+00 : f32
    %57 = vector.broadcast %cst_24 : f32 to vector<16x128xf32>
    %58 = arith.subf %57, %45 : vector<16x128xf32>
    %59 = arith.mulf %56, %58 : vector<16x128xf32>
    %cst_25 = arith.constant 5.000000e-02 : f32
    %60 = vector.broadcast %cst_25 : f32 to vector<16x128xf32>
    %61 = arith.mulf %60, %54 : vector<16x128xf32>
    %62 = arith.addf %59, %61 : vector<16x128xf32>
    %cst_26 = arith.constant 2.000000e-01 : f32
    %63 = vector.broadcast %cst_26 : f32 to vector<16x128xf32>
    %64 = arith.cmpf oge, %62, %63 : vector<16x128xf32>
    %65 = arith.extui %64 : vector<16x128xi1> to vector<16x128xi32>
    %66 = arith.sitofp %65 : vector<16x128xi32> to vector<16x128xf32>
    %67 = arith.truncf %66 : vector<16x128xf32> to vector<16x128xbf16>
    %c2 = arith.constant 2 : index
    %c0_27 = arith.constant 0 : index
    %c0_28 = arith.constant 0 : index
    %68 = vector.load %arg3[%c2, %c0_27, %c0_28] : memref<8x16x128xbf16, #tpu.memory_space<vmem>>, vector<1x16x128xbf16>
    %69 = vector.shape_cast %68 : vector<1x16x128xbf16> to vector<16x128xbf16>
    %70 = vector.shape_cast %67 : vector<16x128xbf16> to vector<1x16x128xbf16>
    tpu.vector_store %arg3[%c2, %c0_27, %c0_28], %70 {strides = array<i32>} : memref<8x16x128xbf16, #tpu.memory_space<vmem>>, vector<1x16x128xbf16>,
    %cst_29 = arith.constant 5.000000e-01 : f32
    %71 = vector.broadcast %cst_29 : f32 to vector<16x128xf32>
    %72 = arith.mulf %71, %54 : vector<16x128xf32>
    %73 = vector.extract_strided_slice %4 {offsets = [3, 0, 0], sizes = [1, 16, 128], strides = [1, 1, 1]} : vector<8x16x128xf32> to vector<1x16x128xf32>
    %74 = vector.shape_cast %73 : vector<1x16x128xf32> to vector<16x128xf32>
    %75 = arith.addf %72, %74 : vector<16x128xf32>
    %cst_30 = arith.constant 7.500000e-01 : f32
    %76 = vector.broadcast %cst_30 : f32 to vector<16x128xf32>
    %77 = arith.mulf %76, %62 : vector<16x128xf32>
    %cst_31 = arith.constant 1.000000e+00 : f32
    %78 = vector.broadcast %cst_31 : f32 to vector<16x128xf32>
    %79 = arith.subf %78, %66 : vector<16x128xf32>
    %80 = arith.mulf %77, %79 : vector<16x128xf32>
    %cst_32 = arith.constant 5.000000e-02 : f32
    %81 = vector.broadcast %cst_32 : f32 to vector<16x128xf32>
    %82 = arith.mulf %81, %75 : vector<16x128xf32>
    %83 = arith.addf %80, %82 : vector<16x128xf32>
    %cst_33 = arith.constant 2.000000e-01 : f32
    %84 = vector.broadcast %cst_33 : f32 to vector<16x128xf32>
    %85 = arith.cmpf oge, %83, %84 : vector<16x128xf32>
    %86 = arith.extui %85 : vector<16x128xi1> to vector<16x128xi32>
    %87 = arith.sitofp %86 : vector<16x128xi32> to vector<16x128xf32>
    %88 = arith.truncf %87 : vector<16x128xf32> to vector<16x128xbf16>
    %c3 = arith.constant 3 : index
    %c0_34 = arith.constant 0 : index
    %c0_35 = arith.constant 0 : index
    %89 = vector.load %arg3[%c3, %c0_34, %c0_35] : memref<8x16x128xbf16, #tpu.memory_space<vmem>>, vector<1x16x128xbf16>
    %90 = vector.shape_cast %89 : vector<1x16x128xbf16> to vector<16x128xbf16>
    %91 = vector.shape_cast %88 : vector<16x128xbf16> to vector<1x16x128xbf16>
    tpu.vector_store %arg3[%c3, %c0_34, %c0_35], %91 {strides = array<i32>} : memref<8x16x128xbf16, #tpu.memory_space<vmem>>, vector<1x16x128xbf16>,
    %cst_36 = arith.constant 5.000000e-01 : f32
    %92 = vector.broadcast %cst_36 : f32 to vector<16x128xf32>
    %93 = arith.mulf %92, %75 : vector<16x128xf32>
    %94 = vector.extract_strided_slice %4 {offsets = [4, 0, 0], sizes = [1, 16, 128], strides = [1, 1, 1]} : vector<8x16x128xf32> to vector<1x16x128xf32>
    %95 = vector.shape_cast %94 : vector<1x16x128xf32> to vector<16x128xf32>
    %96 = arith.addf %93, %95 : vector<16x128xf32>
    %cst_37 = arith.constant 7.500000e-01 : f32
    %97 = vector.broadcast %cst_37 : f32 to vector<16x128xf32>
    %98 = arith.mulf %97, %83 : vector<16x128xf32>
    %cst_38 = arith.constant 1.000000e+00 : f32
    %99 = vector.broadcast %cst_38 : f32 to vector<16x128xf32>
    %100 = arith.subf %99, %87 : vector<16x128xf32>
    %101 = arith.mulf %98, %100 : vector<16x128xf32>
    %cst_39 = arith.constant 5.000000e-02 : f32
    %102 = vector.broadcast %cst_39 : f32 to vector<16x128xf32>
    %103 = arith.mulf %102, %96 : vector<16x128xf32>
    %104 = arith.addf %101, %103 : vector<16x128xf32>
    %cst_40 = arith.constant 2.000000e-01 : f32
    %105 = vector.broadcast %cst_40 : f32 to vector<16x128xf32>
    %106 = arith.cmpf oge, %104, %105 : vector<16x128xf32>
    %107 = arith.extui %106 : vector<16x128xi1> to vector<16x128xi32>
    %108 = arith.sitofp %107 : vector<16x128xi32> to vector<16x128xf32>
    %109 = arith.truncf %108 : vector<16x128xf32> to vector<16x128xbf16>
    %c4 = arith.constant 4 : index
    %c0_41 = arith.constant 0 : index
    %c0_42 = arith.constant 0 : index
    %110 = vector.load %arg3[%c4, %c0_41, %c0_42] : memref<8x16x128xbf16, #tpu.memory_space<vmem>>, vector<1x16x128xbf16>
    %111 = vector.shape_cast %110 : vector<1x16x128xbf16> to vector<16x128xbf16>
    %112 = vector.shape_cast %109 : vector<16x128xbf16> to vector<1x16x128xbf16>
    tpu.vector_store %arg3[%c4, %c0_41, %c0_42], %112 {strides = array<i32>} : memref<8x16x128xbf16, #tpu.memory_space<vmem>>, vector<1x16x128xbf16>,
    %cst_43 = arith.constant 5.000000e-01 : f32
    %113 = vector.broadcast %cst_43 : f32 to vector<16x128xf32>
    %114 = arith.mulf %113, %96 : vector<16x128xf32>
    %115 = vector.extract_strided_slice %4 {offsets = [5, 0, 0], sizes = [1, 16, 128], strides = [1, 1, 1]} : vector<8x16x128xf32> to vector<1x16x128xf32>
    %116 = vector.shape_cast %115 : vector<1x16x128xf32> to vector<16x128xf32>
    %117 = arith.addf %114, %116 : vector<16x128xf32>
    %cst_44 = arith.constant 7.500000e-01 : f32
    %118 = vector.broadcast %cst_44 : f32 to vector<16x128xf32>
    %119 = arith.mulf %118, %104 : vector<16x128xf32>
    %cst_45 = arith.constant 1.000000e+00 : f32
    %120 = vector.broadcast %cst_45 : f32 to vector<16x128xf32>
    %121 = arith.subf %120, %108 : vector<16x128xf32>
    %122 = arith.mulf %119, %121 : vector<16x128xf32>
    %cst_46 = arith.constant 5.000000e-02 : f32
    %123 = vector.broadcast %cst_46 : f32 to vector<16x128xf32>
    %124 = arith.mulf %123, %117 : vector<16x128xf32>
    %125 = arith.addf %122, %124 : vector<16x128xf32>
    %cst_47 = arith.constant 2.000000e-01 : f32
    %126 = vector.broadcast %cst_47 : f32 to vector<16x128xf32>
    %127 = arith.cmpf oge, %125, %126 : vector<16x128xf32>
    %128 = arith.extui %127 : vector<16x128xi1> to vector<16x128xi32>
    %129 = arith.sitofp %128 : vector<16x128xi32> to vector<16x128xf32>
    %130 = arith.truncf %129 : vector<16x128xf32> to vector<16x128xbf16>
    %c5 = arith.constant 5 : index
    %c0_48 = arith.constant 0 : index
    %c0_49 = arith.constant 0 : index
    %131 = vector.load %arg3[%c5, %c0_48, %c0_49] : memref<8x16x128xbf16, #tpu.memory_space<vmem>>, vector<1x16x128xbf16>
    %132 = vector.shape_cast %131 : vector<1x16x128xbf16> to vector<16x128xbf16>
    %133 = vector.shape_cast %130 : vector<16x128xbf16> to vector<1x16x128xbf16>
    tpu.vector_store %arg3[%c5, %c0_48, %c0_49], %133 {strides = array<i32>} : memref<8x16x128xbf16, #tpu.memory_space<vmem>>, vector<1x16x128xbf16>,
    %cst_50 = arith.constant 5.000000e-01 : f32
    %134 = vector.broadcast %cst_50 : f32 to vector<16x128xf32>
    %135 = arith.mulf %134, %117 : vector<16x128xf32>
    %136 = vector.extract_strided_slice %4 {offsets = [6, 0, 0], sizes = [1, 16, 128], strides = [1, 1, 1]} : vector<8x16x128xf32> to vector<1x16x128xf32>
    %137 = vector.shape_cast %136 : vector<1x16x128xf32> to vector<16x128xf32>
    %138 = arith.addf %135, %137 : vector<16x128xf32>
    %cst_51 = arith.constant 7.500000e-01 : f32
    %139 = vector.broadcast %cst_51 : f32 to vector<16x128xf32>
    %140 = arith.mulf %139, %125 : vector<16x128xf32>
    %cst_52 = arith.constant 1.000000e+00 : f32
    %141 = vector.broadcast %cst_52 : f32 to vector<16x128xf32>
    %142 = arith.subf %141, %129 : vector<16x128xf32>
    %143 = arith.mulf %140, %142 : vector<16x128xf32>
    %cst_53 = arith.constant 5.000000e-02 : f32
    %144 = vector.broadcast %cst_53 : f32 to vector<16x128xf32>
    %145 = arith.mulf %144, %138 : vector<16x128xf32>
    %146 = arith.addf %143, %145 : vector<16x128xf32>
    %cst_54 = arith.constant 2.000000e-01 : f32
    %147 = vector.broadcast %cst_54 : f32 to vector<16x128xf32>
    %148 = arith.cmpf oge, %146, %147 : vector<16x128xf32>
    %149 = arith.extui %148 : vector<16x128xi1> to vector<16x128xi32>
    %150 = arith.sitofp %149 : vector<16x128xi32> to vector<16x128xf32>
    %151 = arith.truncf %150 : vector<16x128xf32> to vector<16x128xbf16>
    %c6 = arith.constant 6 : index
    %c0_55 = arith.constant 0 : index
    %c0_56 = arith.constant 0 : index
    %152 = vector.load %arg3[%c6, %c0_55, %c0_56] : memref<8x16x128xbf16, #tpu.memory_space<vmem>>, vector<1x16x128xbf16>
    %153 = vector.shape_cast %152 : vector<1x16x128xbf16> to vector<16x128xbf16>
    %154 = vector.shape_cast %151 : vector<16x128xbf16> to vector<1x16x128xbf16>
    tpu.vector_store %arg3[%c6, %c0_55, %c0_56], %154 {strides = array<i32>} : memref<8x16x128xbf16, #tpu.memory_space<vmem>>, vector<1x16x128xbf16>,
    %cst_57 = arith.constant 5.000000e-01 : f32
    %155 = vector.broadcast %cst_57 : f32 to vector<16x128xf32>
    %156 = arith.mulf %155, %138 : vector<16x128xf32>
    %157 = vector.extract_strided_slice %4 {offsets = [7, 0, 0], sizes = [1, 16, 128], strides = [1, 1, 1]} : vector<8x16x128xf32> to vector<1x16x128xf32>
    %158 = vector.shape_cast %157 : vector<1x16x128xf32> to vector<16x128xf32>
    %159 = arith.addf %156, %158 : vector<16x128xf32>
    %cst_58 = arith.constant 7.500000e-01 : f32
    %160 = vector.broadcast %cst_58 : f32 to vector<16x128xf32>
    %161 = arith.mulf %160, %146 : vector<16x128xf32>
    %cst_59 = arith.constant 1.000000e+00 : f32
    %162 = vector.broadcast %cst_59 : f32 to vector<16x128xf32>
    %163 = arith.subf %162, %150 : vector<16x128xf32>
    %164 = arith.mulf %161, %163 : vector<16x128xf32>
    %cst_60 = arith.constant 5.000000e-02 : f32
    %165 = vector.broadcast %cst_60 : f32 to vector<16x128xf32>
    %166 = arith.mulf %165, %159 : vector<16x128xf32>
    %167 = arith.addf %164, %166 : vector<16x128xf32>
    %cst_61 = arith.constant 2.000000e-01 : f32
    %168 = vector.broadcast %cst_61 : f32 to vector<16x128xf32>
    %169 = arith.cmpf oge, %167, %168 : vector<16x128xf32>
    %170 = arith.extui %169 : vector<16x128xi1> to vector<16x128xi32>
    %171 = arith.sitofp %170 : vector<16x128xi32> to vector<16x128xf32>
    %172 = arith.truncf %171 : vector<16x128xf32> to vector<16x128xbf16>
    %c7 = arith.constant 7 : index
    %c0_62 = arith.constant 0 : index
    %c0_63 = arith.constant 0 : index
    %173 = vector.load %arg3[%c7, %c0_62, %c0_63] : memref<8x16x128xbf16, #tpu.memory_space<vmem>>, vector<1x16x128xbf16>
    %174 = vector.shape_cast %173 : vector<1x16x128xbf16> to vector<16x128xbf16>
    %175 = vector.shape_cast %172 : vector<16x128xbf16> to vector<1x16x128xbf16>
    tpu.vector_store %arg3[%c7, %c0_62, %c0_63], %175 {strides = array<i32>} : memref<8x16x128xbf16, #tpu.memory_space<vmem>>, vector<1x16x128xbf16>,
    return
  }
  func.func @transform_0(%arg0: i32) -> (i32, i32, i32) {
    %c0_i32 = arith.constant 0 : i32
    %c0_i32_0 = arith.constant 0 : i32
    %c0_i32_1 = arith.constant 0 : i32
    return %c0_i32, %arg0, %c0_i32_0 : i32, i32, i32
  }
  func.func @transform_1(%arg0: i32) -> (i32, i32) {
    %c0_i32 = arith.constant 0 : i32
    %c0_i32_0 = arith.constant 0 : i32
    %c0_i32_1 = arith.constant 0 : i32
    return %c0_i32, %c0_i32_0 : i32, i32
  }
  func.func @transform_2(%arg0: i32) -> (i32, i32, i32) {
    %c0_i32 = arith.constant 0 : i32
    %c0_i32_0 = arith.constant 0 : i32
    %c0_i32_1 = arith.constant 0 : i32
    return %c0_i32, %arg0, %c0_i32_0 : i32, i32, i32
  }
}

</mosaic_0001>

<bundles_post_ra>
// kernel: tpu_custom_call.1
= control target key start
LH: loop header
LB: loop body
LE: loop exit
PB: predicated region body
PF: predicated region fallthrough
CT: control target
= control target key end

     0   :  { %7 = vsyncpa [#allocation3], 0  ;;  %s818_s0 = inlined_call_operand.hbm [shape: bf16[8,16,128], index: 0, kind: input, shape index: {}]   ;;  %s819_s1 = inlined_call_operand.hbm [shape: bf16[128,128], index: 1, kind: input, shape index: {}]   ;;  %s820_s2 = inlined_call_operand.hbm [shape: bf16[8,16,128], index: 2, kind: output, shape index: {}]  }
   0x1   :  { %8 = vsyncpa [#allocation6], 0 }
   0x2   :  { %9 = vsyncpa [#allocation4], 0  ;;  %s763_s9 = smov [#allocation2]  }
   0x3   :  { %s15_s10 = sshll.u32 %s763_s9, 4  ;;  %s16_s10 = int_to_ptr.vmem [resolvable:$true] %s15_s10 }
   0x4   :  { %s705_s11 = scalar_lea.vmem %s16_s10, 1024  ;;  %p710_p1 = scmp.lt.s32.totalorder %s16_s10, %s16_s10 }
   0x5   :  { %p706_p0 = scmp.ne.s32.totalorder %s16_s10, %s705_s11  ;;  %p711_p2 = scmp.lt.s32.totalorder %s705_s11, %s705_s11 }
   0x7   :  { %p712_p3 = por %p711_p2, %p710_p1 }
   0x9   :  { %p713_p4 = pnand %p712_p3, %p706_p0 }
   0xb   :  { %716 = shalt.err (!%p713_p4)
}
   0xc   :  { %s764_s12 = smov 64   ;;  %s765_s13 = smov 4  }
   0xd   :  { %21 = dma.hbm_to_vmem [thread:$0]  %s818_s0, 1024, %s16_s10, [#allocation3], %s764_s12, %s764_s12, %s765_s13  }
   0xe   :  { %s766_s16 = smov [#allocation5]  }
   0xf   :  { %s27_s17 = sshll.u32 %s766_s16, 4  ;;  %s28_s17 = int_to_ptr.vmem [resolvable:$true] %s27_s17 }
  0x10   :  { %s725_s18 = scalar_lea.vmem %s28_s17, 1024  ;;  %p730_p6 = scmp.lt.s32.totalorder %s28_s17, %s28_s17 }
  0x11   :  { %p726_p5 = scmp.ne.s32.totalorder %s28_s17, %s725_s18  ;;  %p731_p7 = scmp.lt.s32.totalorder %s725_s18, %s725_s18 }
  0x13   :  { %p732_p8 = por %p731_p7, %p730_p6 }
  0x15   :  { %p733_p9 = pnand %p732_p8, %p726_p5 }
  0x17   :  { %736 = shalt.err (!%p733_p9)
}
  0x18   :  { %33 = dma.hbm_to_vmem [thread:$0]  %s819_s1, 1024, %s28_s17, [#allocation6], %s764_s12, %s764_s12, %s765_s13  }
  0x19   :  { %757 = dma.done.wait [#allocation3], 1024  }
  0x1a   :  { %758 = vsyncadd [#allocation3], 4294966272 }
  0x1b   :  { %759 = dma.done.wait [#allocation6], 1024  }
  0x1c   :  { %760 = vsyncadd [#allocation6], 4294966272  ;;  %v681_v0 = vld [vmem:[#allocation5 + $0x38] sm:$0xff]   ;;  %v682_v1 = vld [vmem:[#allocation5 + $0x30] sm:$0xff]   ;;  %v767_v22 = vmov 0.0   ;;  %s768_s0 = smov [#allocation7]  }
  0x1d   :  { %627 = vmatprep.subr.bf16.mxu0 %v681_v0  ;;  %659 = vmatprep.subr.bf16.mxu1 %v681_v0  ;;  %v683_v2 = vld [vmem:[#allocation5 + $0x28] sm:$0xff]   ;;  %v684_v3 = vld [vmem:[#allocation5 + $0x20] sm:$0xff]   ;;  %v685_v5 = vld [vmem:[#allocation5 + $0x18] sm:$0xff]   ;;  %s510_s1 = sshll.u32 %s768_s0, 4  ;;  %s511_s1 = int_to_ptr.vmem [resolvable:$true] %s510_s1 }
  0x1e   :  { %628 = vmatpush3.bf16.msra.mxu0 %v681_v0  ;;  %667 = vmatpush3.bf16.msra.mxu1 %v681_v0  ;;  %v689_v4 = vld [vmem:[#allocation2] sm:$0xff]   ;;  %v686_v7 = vld [vmem:[#allocation5 + $0x10] sm:$0xff]   ;;  %v687_v8 = vld [vmem:[#allocation5 + $0x8] sm:$0xff]   ;;  %s737_s21 = scalar_lea.vmem %s511_s1, 1024  ;;  %p742_p11 = scmp.lt.s32.totalorder %s511_s1, %s511_s1 }
  0x1f   :  { %629 = vmatprep.subr.bf16.mxu0 %v682_v1  ;;  %660 = vmatprep.subr.bf16.mxu1 %v682_v1  ;;  %v693_v6 = vld [vmem:[#allocation2 + $0x20] sm:$0xff]   ;;  %v690_v10 = vld [vmem:[#allocation2 + $0x8] sm:$0xff]   ;;  %v691_v12 = vld [vmem:[#allocation2 + $0x10] sm:$0xff]   ;;  %p738_p10 = scmp.ne.s32.totalorder %s511_s1, %s737_s21  ;;  %p743_p12 = scmp.lt.s32.totalorder %s737_s21, %s737_s21 }
  0x20   :  { %643 = vmatprep.mubr.bf16.mxu0 %v689_v4  ;;  %651 = vmatprep.mubr.bf16.mxu1 %v693_v6  ;;  %v688_v9 = vld [vmem:[#allocation5] sm:$0xff]   ;;  %v694_v11 = vld [vmem:[#allocation2 + $0x28] sm:$0xff]   ;;  %v695_v13 = vld [vmem:[#allocation2 + $0x30] sm:$0xff]  }
  0x21   :  { %v692_v14 = vld [vmem:[#allocation2 + $0x18] sm:$0xff]   ;;  %p744_p13 = por %p743_p12, %p742_p11 }
  0x22   :  { %630 = vmatpush3.bf16.msra.mxu0 %v682_v1  ;;  %668 = vmatpush3.bf16.msra.mxu1 %v682_v1  ;;  %v696_v15 = vld [vmem:[#allocation2 + $0x38] sm:$0xff]  }
  0x23   :  { %631 = vmatprep.subr.bf16.mxu0 %v683_v2  ;;  %661 = vmatprep.subr.bf16.mxu1 %v683_v2  ;;  %p745_p0 = pnand %p744_p13, %p738_p10 }
  0x26   :  { %632 = vmatpush3.bf16.msra.mxu0 %v683_v2  ;;  %669 = vmatpush3.bf16.msra.mxu1 %v683_v2 }
  0x27   :  { %633 = vmatprep.subr.bf16.mxu0 %v684_v3  ;;  %662 = vmatprep.subr.bf16.mxu1 %v684_v3 }
  0x2a   :  { %634 = vmatpush3.bf16.msra.mxu0 %v684_v3  ;;  %670 = vmatpush3.bf16.msra.mxu1 %v684_v3 }
  0x2b   :  { %635 = vmatprep.subr.bf16.mxu0 %v685_v5  ;;  %663 = vmatprep.subr.bf16.mxu1 %v685_v5 }
  0x2e   :  { %636 = vmatpush3.bf16.msra.mxu0 %v685_v5  ;;  %671 = vmatpush3.bf16.msra.mxu1 %v685_v5 }
  0x2f   :  { %637 = vmatprep.subr.bf16.mxu0 %v686_v7  ;;  %664 = vmatprep.subr.bf16.mxu1 %v686_v7 }
  0x32   :  { %638 = vmatpush3.bf16.msra.mxu0 %v686_v7  ;;  %672 = vmatpush3.bf16.msra.mxu1 %v686_v7 }
  0x33   :  { %639 = vmatprep.subr.bf16.mxu0 %v687_v8  ;;  %665 = vmatprep.subr.bf16.mxu1 %v687_v8 }
  0x36   :  { %640 = vmatpush3.bf16.msra.mxu0 %v687_v8  ;;  %673 = vmatpush3.bf16.msra.mxu1 %v687_v8 }
  0x37   :  { %641 = vmatprep.subr.bf16.mxu0 %v688_v9  ;;  %666 = vmatprep.subr.bf16.mxu1 %v688_v9 }
  0x3a   :  { %642 = vmatpush3.bf16.msra.mxu0 %v688_v9  ;;  %674 = vmatpush3.bf16.msra.mxu1 %v688_v9 }
  0x3d   :  { %644 = vmatmul.mubr.bf16.vlgmr.msra.gmra.mxu0 %v690_v10  ;;  %652 = vmatmul.mubr.bf16.vlgmr.msra.gmra.mxu1 %v694_v11 }
  0x3e   :  { %647 = vmatprep.mubr.bf16.mxu0 %v691_v12  ;;  %655 = vmatprep.mubr.bf16.mxu1 %v695_v13 }
  0x45   :  { %648 = vmatmul.mubr.bf16.gmra.mxu0 %v692_v14  ;;  %656 = vmatmul.mubr.bf16.gmra.mxu1 %v696_v15 }
  0xfd   :  { %v645_v16 = vpop.f32.mrf.mxu0  ;;  %v653_v55 = vpop.f32.mrf.mxu1 }
  0xff   :  { %v203_v17 = vpop.f32.mrf.mxu0  ;;  %v235_v1 = vpop.f32.mrf.mxu1 }
 0x100   :  { %v268_v18 = vmul.f32 0.05, %v203_v17  ;;  %v288_v19 = vmul.f32 0.5, %v203_v17 }
 0x101   :  { %v646_v20 = vpop.f32.mrf.mxu0  ;;  %v654_v10 = vpop.f32.mrf.mxu1 }
 0x102   :  { %vm272_vm0 = vcmp.ge.f32.partialorder %v268_v18, 0.2  ;;  %v290_v21 = vadd.f32 %v645_v16, %v288_v19  ;;  %v292_v25 = vmul.f32 0.75, %v268_v18 }
 0x103   :  { %v539_v23 = vsel %vm272_vm0, 1.0, %v767_v22  ;;  %v206_v24 = vpop.f32.mrf.mxu0 }
 0x104   :  { %v294_v26 = vsub.f32 1.0, %v539_v23  ;;  %v269_v27 = vmul.f32 0.05, %v206_v24  ;;  %v289_v28 = vmul.f32 0.5, %v206_v24  ;;  %v298_v31 = vmul.f32 0.05, %v290_v21 }
 0x105   :  { %v649_v29 = vpop.f32.mrf.mxu0  ;;  %v319_v35 = vmul.f32 0.5, %v290_v21 }
 0x106   :  { %v296_v30 = vmul.f32 %v294_v26, %v292_v25  ;;  %vm273_vm1 = vcmp.ge.f32.partialorder %v269_v27, 0.2  ;;  %v291_v32 = vadd.f32 %v646_v20, %v289_v28  ;;  %v293_v38 = vmul.f32 0.75, %v269_v27  ;;  %v238_v20 = vpop.f32.mrf.mxu1 }
 0x107   :  { %v540_v33 = vsel %vm273_vm1, 1.0, %v767_v22  ;;  %v219_v34 = vpop.f32.mrf.mxu0 }
 0x108   :  { %v300_v36 = vadd.f32 %v298_v31, %v296_v30  ;;  %v588_v37 = vpack.c.bf16 %v540_v33, %v539_v23  ;;  %v295_v39 = vsub.f32 1.0, %v540_v33  ;;  %v321_v40 = vadd.f32 %v319_v35, %v219_v34  ;;  %v657_v30 = vpop.f32.mrf.mxu1 }
 0x109   :  { %v650_v41 = vpop.f32.mrf.mxu0  ;;  %v299_v43 = vmul.f32 0.05, %v291_v32  ;;  %v320_v49 = vmul.f32 0.5, %v291_v32 }
 0x10a   :  { %vm302_vm2 = vcmp.ge.f32.partialorder %v300_v36, 0.2  ;;  %589 = vst [vmem:[#allocation7] sm:$0xff] %v588_v37   ;;  %v297_v42 = vmul.f32 %v295_v39, %v293_v38  ;;  %v323_v47 = vmul.f32 0.75, %v300_v36  ;;  %v350_v50 = vmul.f32 0.5, %v321_v40 }
 0x10b   :  { %v543_v44 = vsel %vm302_vm2, 1.0, %v767_v22  ;;  %v222_v45 = vpop.f32.mrf.mxu0  ;;  %v329_v52 = vmul.f32 0.05, %v321_v40  ;;  %v251_v40 = vpop.f32.mrf.mxu1 }
 0x10c   :  { %v301_v46 = vadd.f32 %v299_v43, %v297_v42  ;;  %v325_v48 = vsub.f32 1.0, %v543_v44  ;;  %v322_v53 = vadd.f32 %v320_v49, %v222_v45  ;;  %v352_v60 = vadd.f32 %v649_v29, %v350_v50 }
 0x10d   :  { %v658_v49 = vpop.f32.mrf.mxu1 }
 0x10e   :  { %vm303_vm3 = vcmp.ge.f32.partialorder %v301_v46, 0.2  ;;  %v327_v51 = vmul.f32 %v325_v48, %v323_v47  ;;  %v324_v58 = vmul.f32 0.75, %v301_v46  ;;  %v330_v62 = vmul.f32 0.05, %v322_v53 }
 0x10f   :  { %v544_v54 = vsel %vm303_vm3, 1.0, %v767_v22  ;;  %v351_v63 = vmul.f32 0.5, %v322_v53  ;;  %v381_v5 = vmul.f32 0.5, %v352_v60  ;;  %v360_v7 = vmul.f32 0.05, %v352_v60 }
 0x110   :  { %v331_v56 = vadd.f32 %v329_v52, %v327_v51  ;;  %v591_v57 = vpack.c.bf16 %v544_v54, %v543_v44  ;;  %v326_v59 = vsub.f32 1.0, %v544_v54 }
 0x111   :  { %v353_v8 = vadd.f32 %v650_v41, %v351_v63  ;;  %v383_v15 = vadd.f32 %v381_v5, %v235_v1 }
 0x112   :  { %vm333_vm4 = vcmp.ge.f32.partialorder %v331_v56, 0.2  ;;  %592 = vst [vmem:[#allocation7 + $0x8] sm:$0xff] %v591_v57   ;;  %v328_v61 = vmul.f32 %v326_v59, %v324_v58  ;;  %v354_v2 = vmul.f32 0.75, %v331_v56  ;;  %v254_v59 = vpop.f32.mrf.mxu1 }
 0x113   :  { %v547_v0 = vsel %vm333_vm4, 1.0, %v767_v22  ;;  %v361_v17 = vmul.f32 0.05, %v353_v8  ;;  %v382_v18 = vmul.f32 0.5, %v353_v8  ;;  %v412_v25 = vmul.f32 0.5, %v383_v15 }
 0x114   :  { %v356_v3 = vsub.f32 1.0, %v547_v0  ;;  %v332_v4 = vadd.f32 %v330_v62, %v328_v61  ;;  %v391_v27 = vmul.f32 0.05, %v383_v15 }
 0x115   :  { %v384_v28 = vadd.f32 %v382_v18, %v238_v20  ;;  %v414_v35 = vadd.f32 %v653_v55, %v412_v25 }
 0x116   :  { %v358_v6 = vmul.f32 %v356_v3, %v354_v2  ;;  %vm334_vm5 = vcmp.ge.f32.partialorder %v332_v4, 0.2  ;;  %v355_v12 = vmul.f32 0.75, %v332_v4 }
 0x117   :  { %v548_v9 = vsel %vm334_vm5, 1.0, %v767_v22  ;;  %v392_v37 = vmul.f32 0.05, %v384_v28  ;;  %v413_v38 = vmul.f32 0.5, %v384_v28  ;;  %v443_v44 = vmul.f32 0.5, %v414_v35 }
 0x118   :  { %v594_v11 = vpack.c.bf16 %v548_v9, %v547_v0  ;;  %v357_v13 = vsub.f32 1.0, %v548_v9  ;;  %v362_v14 = vadd.f32 %v360_v7, %v358_v6  ;;  %v422_v46 = vmul.f32 0.05, %v414_v35 }
 0x119   :  { %v415_v47 = vadd.f32 %v654_v10, %v413_v38  ;;  %v445_v54 = vadd.f32 %v443_v44, %v251_v40 }
 0x11a   :  { %595 = vst [vmem:[#allocation7 + $0x10] sm:$0xff] %v594_v11   ;;  %v359_v16 = vmul.f32 %v357_v13, %v355_v12  ;;  %vm364_vm6 = vcmp.ge.f32.partialorder %v362_v14, 0.2  ;;  %v385_v21 = vmul.f32 0.75, %v362_v14 }
 0x11b   :  { %v551_v19 = vsel %vm364_vm6, 1.0, %v767_v22  ;;  %v423_v56 = vmul.f32 0.05, %v415_v47  ;;  %v444_v57 = vmul.f32 0.5, %v415_v47  ;;  %v474_v63 = vmul.f32 0.5, %v445_v54 }
 0x11c   :  { %v387_v23 = vsub.f32 1.0, %v551_v19  ;;  %v363_v24 = vadd.f32 %v361_v17, %v359_v16  ;;  %v453_v1 = vmul.f32 0.05, %v445_v54 }
 0x11d   :  { %v446_v2 = vadd.f32 %v444_v57, %v254_v59  ;;  %v476_v8 = vadd.f32 %v657_v30, %v474_v63 }
 0x11e   :  { %v389_v26 = vmul.f32 %v387_v23, %v385_v21  ;;  %vm365_vm7 = vcmp.ge.f32.partialorder %v363_v24, 0.2  ;;  %v386_v33 = vmul.f32 0.75, %v363_v24 }
 0x11f   :  { %v552_v29 = vsel %vm365_vm7, 1.0, %v767_v22  ;;  %v454_v10 = vmul.f32 0.05, %v446_v2  ;;  %v475_v11 = vmul.f32 0.5, %v446_v2  ;;  %v484_v17 = vmul.f32 0.05, %v476_v8 }
 0x120   :  { %v393_v31 = vadd.f32 %v391_v27, %v389_v26  ;;  %v597_v32 = vpack.c.bf16 %v552_v29, %v551_v19  ;;  %v388_v34 = vsub.f32 1.0, %v552_v29 }
 0x121   :  { %v477_v18 = vadd.f32 %v658_v49, %v475_v11 }
 0x122   :  { %vm395_vm8 = vcmp.ge.f32.partialorder %v393_v31, 0.2  ;;  %598 = vst [vmem:[#allocation7 + $0x18] sm:$0xff] %v597_v32   ;;  %v390_v36 = vmul.f32 %v388_v34, %v386_v33  ;;  %v416_v41 = vmul.f32 0.75, %v393_v31 }
 0x123   :  { %v555_v39 = vsel %vm395_vm8, 1.0, %v767_v22  ;;  %v485_v26 = vmul.f32 0.05, %v477_v18 }
 0x124   :  { %v418_v42 = vsub.f32 1.0, %v555_v39  ;;  %v394_v43 = vadd.f32 %v392_v37, %v390_v36 }
 0x126   :  { %v420_v45 = vmul.f32 %v418_v42, %v416_v41  ;;  %vm396_vm9 = vcmp.ge.f32.partialorder %v394_v43, 0.2  ;;  %v417_v51 = vmul.f32 0.75, %v394_v43 }
 0x127   :  { %v556_v48 = vsel %vm396_vm9, 1.0, %v767_v22 }
 0x128   :  { %v600_v50 = vpack.c.bf16 %v556_v48, %v555_v39  ;;  %v419_v52 = vsub.f32 1.0, %v556_v48  ;;  %v424_v53 = vadd.f32 %v422_v46, %v420_v45 }
 0x12a   :  { %601 = vst [vmem:[#allocation7 + $0x20] sm:$0xff] %v600_v50   ;;  %v421_v55 = vmul.f32 %v419_v52, %v417_v51  ;;  %vm426_vm10 = vcmp.ge.f32.partialorder %v424_v53, 0.2  ;;  %v447_v60 = vmul.f32 0.75, %v424_v53 }
 0x12b   :  { %v559_v58 = vsel %vm426_vm10, 1.0, %v767_v22 }
 0x12c   :  { %v449_v61 = vsub.f32 1.0, %v559_v58  ;;  %v425_v62 = vadd.f32 %v423_v56, %v421_v55 }
 0x12e   :  { %v451_v0 = vmul.f32 %v449_v61, %v447_v60  ;;  %vm427_vm11 = vcmp.ge.f32.partialorder %v425_v62, 0.2  ;;  %v448_v6 = vmul.f32 0.75, %v425_v62 }
 0x12f   :  { %v560_v3 = vsel %vm427_vm11, 1.0, %v767_v22 }
 0x130   :  { %v455_v4 = vadd.f32 %v453_v1, %v451_v0  ;;  %v603_v5 = vpack.c.bf16 %v560_v3, %v559_v58  ;;  %v450_v7 = vsub.f32 1.0, %v560_v3 }
 0x132   :  { %vm457_vm12 = vcmp.ge.f32.partialorder %v455_v4, 0.2  ;;  %604 = vst [vmem:[#allocation7 + $0x28] sm:$0xff] %v603_v5   ;;  %v452_v9 = vmul.f32 %v450_v7, %v448_v6  ;;  %v478_v13 = vmul.f32 0.75, %v455_v4 }
 0x133   :  { %v563_v12 = vsel %vm457_vm12, 1.0, %v767_v22 }
 0x134   :  { %v480_v14 = vsub.f32 1.0, %v563_v12  ;;  %v456_v15 = vadd.f32 %v454_v10, %v452_v9 }
 0x136   :  { %v482_v16 = vmul.f32 %v480_v14, %v478_v13  ;;  %vm458_vm13 = vcmp.ge.f32.partialorder %v456_v15, 0.2  ;;  %v479_v23 = vmul.f32 0.75, %v456_v15 }
 0x137   :  { %v564_v19 = vsel %vm458_vm13, 1.0, %v767_v22 }
 0x138   :  { %v486_v20 = vadd.f32 %v484_v17, %v482_v16  ;;  %v606_v21 = vpack.c.bf16 %v564_v19, %v563_v12  ;;  %v481_v24 = vsub.f32 1.0, %v564_v19 }
 0x13a   :  { %607 = vst [vmem:[#allocation7 + $0x30] sm:$0xff] %v606_v21   ;;  %v483_v25 = vmul.f32 %v481_v24, %v479_v23  ;;  %vm488_vm14 = vcmp.ge.f32.partialorder %v486_v20, 0.2 }
 0x13b   :  { %v567_v28 = vsel %vm488_vm14, 1.0, %v767_v22 }
 0x13c   :  { %v487_v27 = vadd.f32 %v485_v26, %v483_v25 }
 0x13e   :  { %vm489_vm15 = vcmp.ge.f32.partialorder %v487_v27, 0.2 }
 0x13f   :  { %v568_v29 = vsel %vm489_vm15, 1.0, %v767_v22 }
 0x140   :  { %v609_v30 = vpack.c.bf16 %v568_v29, %v567_v28 }
 0x142   :  { %610 = vst [vmem:[#allocation7 + $0x38] sm:$0xff] %v609_v30  }
 0x143   :  { %748 = shalt.err (!%p745_p0)
}
 0x144   :  { %516 = dma.vmem_to_hbm [thread:$0]  %s511_s1, 1024, %s820_s2, [#allocation4], %s764_s12, %s764_s12, %s765_s13  }
 0x145   :  { %761 = dma.done.wait [#allocation4], 1024  }
 0x146   :  { %762 = vsyncadd [#allocation4], 4294966272 }
 0x147   :  { %520 = vsyncpa [#allocation3], 1 }
 0x148   :  { %521 = vsyncpa [#allocation6], 1 }
 0x149   :  { %522 = vsyncpa [#allocation4], 1 }

</bundles_post_ra>
